<compile_context>
chip_gen: v6e
topology: v6e:2x2x1
jax: 0.10.0
libtpu: 0.0.40
codegen_flags: <defaults>
</compile_context>

<pallas_src>
import math

import jax
import jax.numpy as jnp
from jax.experimental import pallas as pl
from jax.experimental.pallas import tpu as pltpu


# --------------------------------------------------------------------------- #
# Helpers / policy constants
# --------------------------------------------------------------------------- #
_LANE = 128
_SUBLANE = 8
_PALLAS_MIN_ROWS = 128       # below this the whole problem fits in a few vregs
_TARGET_ROW_BLOCK = 512      # ~85% of HBM roofline per the tiling measurements


def _round_up(n: int, m: int) -> int:
    return ((n + m - 1) // m) * m


def _choose_row_block(rows8: int) -> int:
    """rows8 is a multiple of 8. Pick a row block that is a multiple of 8 and,
    for larger batches, yields an even number of blocks (v7x megacore split)."""
    if rows8 <= _TARGET_ROW_BLOCK:
        return rows8
    nb = pl.cdiv(rows8, _TARGET_ROW_BLOCK)
    if nb % 2:
        nb += 1
    return _round_up(pl.cdiv(rows8, nb), _SUBLANE)


# --------------------------------------------------------------------------- #
# Pallas kernel: eps = SiLU(x @ W1 + b1_eff) @ W2 + b2
#   x_ref : (row_block, D)  f32   (true feature width; no lane padding in HBM)
#   w1_ref: (D, HP)         bf16  (HP = H padded to 128; zero pad is inert)
#   b1_ref: (1, HP)         f32   (bias + time embedding, pre-folded)
#   w2_ref: (HP, D)         bf16
#   b2_ref: (1, D)          f32
#   o_ref : (row_block, D)  f32
# --------------------------------------------------------------------------- #
def _epsnet_kernel(x_ref, w1_ref, b1_ref, w2_ref, b2_ref, o_ref):
    x = x_ref[...].astype(jnp.bfloat16)                       # cast in VMEM only
    h = jnp.dot(x, w1_ref[...], preferred_element_type=jnp.float32)
    h = h + b1_ref[...]                                        # f32 bias + temb
    h = h * jax.nn.sigmoid(h)                                  # SiLU in f32 (EUP+VPU)
    out = jnp.dot(h.astype(jnp.bfloat16), w2_ref[...],
                  preferred_element_type=jnp.float32)
    o_ref[...] = out + b2_ref[...]                             # f32 store (masked vst ok)


def _epsnet_pallas(x_rows, w1b, b1_eff, w2b, b2, *, row_block):
    """x_rows: (rows, D) f32 with rows % 8 == 0. Returns (rows, D) f32."""
    rows, D = x_rows.shape
    HP = w1b.shape[1]
    grid = (pl.cdiv(rows, row_block),)

    cost = pl.CostEstimate(
        flops=4 * rows * D * HP,                    # two matmuls
        transcendentals=rows * HP,                  # sigmoid
        bytes_accessed=(8 * rows * D                # x read + out write (f32)
                        + 2 * (D * HP + HP * D)     # bf16 weights
                        + 4 * (HP + D)),            # f32 biases
    )

    return pl.pallas_call(
        _epsnet_kernel,
        out_shape=jax.ShapeDtypeStruct((rows, D), jnp.float32),
        grid_spec=pltpu.PrefetchScalarGridSpec(
            num_scalar_prefetch=0,
            grid=grid,
            in_specs=[
                pl.BlockSpec((row_block, D), lambda r: (r, 0)),  # x rows, true D
                pl.BlockSpec((D, HP), lambda r: (0, 0)),          # W1 (resident)
                pl.BlockSpec((1, HP), lambda r: (0, 0)),          # b1 + temb
                pl.BlockSpec((HP, D), lambda r: (0, 0)),          # W2 (resident)
                pl.BlockSpec((1, D), lambda r: (0, 0)),           # b2
            ],
            out_specs=pl.BlockSpec((row_block, D), lambda r: (r, 0)),
        ),
        compiler_params=pltpu.CompilerParams(
            dimension_semantics=("parallel",)     # row blocks split across v7x TCs
        ),
        cost_estimate=cost,
    )(x_rows, w1b, b1_eff, w2b, b2)


# --------------------------------------------------------------------------- #
# Jitted forward: temb from a *traced* timestep, row tiling, Pallas call.
# All shape arithmetic is static (derived from array shapes).
# --------------------------------------------------------------------------- #
@jax.jit
def _epsnet_forward(x, t, freqs, w1b, b1p, w2b, b2):
    """x: (B, T, D) f32, t: int32 scalar -> (B, T, D) f32."""
    B, T, D = x.shape
    HP = w1b.shape[1]
    H = 2 * freqs.shape[0]

    # Sinusoidal time embedding, folded into the first bias (outside the kernel).
    ang = t.astype(jnp.float32) * freqs                              # (H/2,)
    temb = jnp.concatenate([jnp.sin(ang), jnp.cos(ang)])[None, :]    # (1, H)
    b1_eff = b1p + jnp.pad(temb, ((0, 0), (0, HP - H)))              # (1, HP) f32

    rows = B * T
    x_rows = x.reshape(rows, D)

    if rows < _PALLAS_MIN_ROWS:
        # Toy sizes: fused XLA beats kernel launch + DMA overhead. Same math
        # (bf16 MXU inputs, f32 accumulation) as the Pallas kernel.
        h = jnp.dot(x_rows.astype(jnp.bfloat16), w1b,
                    preferred_element_type=jnp.float32) + b1_eff
        h = h * jax.nn.sigmoid(h)
        out = jnp.dot(h.astype(jnp.bfloat16), w2b,
                      preferred_element_type=jnp.float32) + b2
        return out.reshape(B, T, D)

    rows8 = _round_up(rows, _SUBLANE)
    if rows8 != rows:
        # Rare misalignment: <8 rows of padding (copy-free in the aligned case).
        x_rows = jnp.pad(x_rows, ((0, rows8 - rows), (0, 0)))
    row_block = _choose_row_block(rows8)

    out = _epsnet_pallas(x_rows, w1b, b1_eff, w2b, b2, row_block=row_block)
    if rows8 != rows:
        out = out[:rows]
    return out.reshape(B, T, D)


# --------------------------------------------------------------------------- #
# Synthetic epsnet (deterministic params) + the ProxyEpsilonNet wrapper
# --------------------------------------------------------------------------- #
class SyntheticTrajEpsNet:
    """Time-conditioned MLP epsilon network over (B, T, D) trajectories."""

    def __init__(self, state_dim: int, hidden: int, num_timesteps: int, key):
        assert hidden % 2 == 0, "hidden size must be even for sin/cos embedding"
        k1, k2 = jax.random.split(key)
        self.D = state_dim
        self.H = hidden

        # f32 master parameters (used by the pure-JAX reference).
        self.w1 = (jax.random.normal(k1, (state_dim, hidden), jnp.float32)
                   / math.sqrt(state_dim))
        self.b1 = jnp.zeros((1, hidden), jnp.float32)
        self.w2 = (jax.random.normal(k2, (hidden, state_dim), jnp.float32)
                   / math.sqrt(hidden))
        self.b2 = jnp.zeros((1, state_dim), jnp.float32)

        # Kernel parameters: bf16 MXU weights, hidden padded to one lane width.
        # Zero padding is inert (SiLU(0)=0 and padded W2 rows are zero).
        HP = _round_up(hidden, _LANE)
        self.HP = HP
        self.w1b = jnp.pad(self.w1, ((0, 0), (0, HP - hidden))).astype(jnp.bfloat16)
        self.w2b = jnp.pad(self.w2, ((0, HP - hidden), (0, 0))).astype(jnp.bfloat16)
        self.b1p = jnp.pad(self.b1, ((0, 0), (0, HP - hidden)))   # f32 (1, HP)

        half = hidden // 2
        self.freqs = jnp.exp(
            -math.log(10000.0) * jnp.arange(half, dtype=jnp.float32) / half
        )

        # Standard DDPM-style schedule attributes the proxy re-exposes.
        betas = jnp.linspace(1e-4, 2e-2, num_timesteps, dtype=jnp.float32)
        self.alphas_cumprod = jnp.cumprod(1.0 - betas)
        self.timesteps = jnp.arange(num_timesteps, dtype=jnp.int32)

    def _time_embedding(self, t) -> jnp.ndarray:
        ang = jnp.asarray(t, jnp.float32) * self.freqs
        return jnp.concatenate([jnp.sin(ang), jnp.cos(ang)])[None, :]

    def forward(self, x: jnp.ndarray, t) -> jnp.ndarray:
        # x: (B, T, D) -> (B, T, D); t may be a Python int or a (traced) array.
        t = jnp.asarray(t, dtype=jnp.int32)
        return _epsnet_forward(x, t, self.freqs,
                               self.w1b, self.b1p, self.w2b, self.b2)


class ProxyEpsilonNet:
    """Proxy to treat trajectories as images (JAX/Pallas port of the PyTorch module)."""

    def __init__(self, epsnet: SyntheticTrajEpsNet):
        self.net = epsnet
        self.alphas_cumprod = epsnet.alphas_cumprod
        self.timesteps = epsnet.timesteps

    def forward(self, x: jnp.ndarray, t):
        if x.ndim == 4:
            x = jnp.squeeze(x, axis=1)              # (B, 1, T, D) -> (B, T, D)
        if not isinstance(t, int):
            t = jnp.asarray(t).astype(jnp.int32)    # no host sync, jit/scan safe
        out = self.net.forward(x, t)                # (B, T, D)
        return out[:, None, :, :]                   # unsqueeze(1) -> (B, 1, T, D)


# --------------------------------------------------------------------------- #
if __name__ == "__main__":
    key = jax.random.PRNGKey(0)
    k_param, k_x = jax.random.split(key)

    B, T, D, H = 2, 128, 8, 32          # rows = 256 >= 128 -> Pallas kernel path
    NUM_TIMESTEPS = 100

    epsnet = SyntheticTrajEpsNet(state_dim=D, hidden=H,
                                 num_timesteps=NUM_TIMESTEPS, key=k_param)
    proxy = ProxyEpsilonNet(epsnet)

    # "Trajectory as image": (B, 1, T, D), NCHW-style with a singleton channel.
    x = jax.random.normal(k_x, (B, 1, T, D), jnp.float32)
    t = 17

    out = jax.block_until_ready(proxy.forward(x, t))
    assert out.shape == (B, 1, T, D), out.shape

    # Non-int timestep path (traced-style array t) must match exactly.
    out2 = jax.block_until_ready(proxy.forward(x, jnp.int32(t)))
    assert jnp.allclose(out, out2)

    # Pure-JAX f32 reference of the same synthetic epsnet. The kernel uses bf16
    # MXU inputs with f32 accumulation, so the tolerance is loosened accordingly.
    temb = epsnet._time_embedding(t)
    h_ref = jnp.squeeze(x, 1) @ epsnet.w1 + epsnet.b1 + temb
    h_ref = h_ref * jax.nn.sigmoid(h_ref)
    ref = (h_ref @ epsnet.w2 + epsnet.b2)[:, None, :, :]
    assert jnp.allclose(out, ref, atol=5e-2, rtol=5e-2), \
        float(jnp.max(jnp.abs(out - ref)))

    # Tiny-shape path (fused XLA, no kernel launch) keeps the same semantics.
    x_small = x[:, :, :8, :]                                   # rows = 16 < 128
    out_small = jax.block_until_ready(proxy.forward(x_small, t))
    assert out_small.shape == (B, 1, 8, D)
    assert jnp.allclose(out_small, ref[:, :, :8, :], atol=5e-2, rtol=5e-2)

    print("KERNEL_OK")
</pallas_src>

<mosaic_0001>
module attributes {stable_mosaic.version = 11 : i64} {
  func.func @_epsnet_kernel(%arg0: i32, %arg1: memref<256x8xf32, #tpu.memory_space<vmem>>, %arg2: memref<8x128xbf16, #tpu.memory_space<vmem>>, %arg3: memref<1x128xf32, #tpu.memory_space<vmem>>, %arg4: memref<128x8xbf16, #tpu.memory_space<vmem>>, %arg5: memref<1x8xf32, #tpu.memory_space<vmem>>, %arg6: memref<256x8xf32, #tpu.memory_space<vmem>>) attributes {dimension_semantics = [#tpu.dimension_semantics<parallel>], iteration_bounds = array<i64: 1>, scalar_prefetch = 0 : i64, scratch_operands = 0 : i64, tpu.core_type = #tpu.core_type<tc>, window_params = [{transform_indices = @transform_0, window_bounds = array<i64: 256, 8>}, {pipeline_mode = #tpu.pipeline_mode<synchronous>, transform_indices = @transform_1, window_bounds = array<i64: 8, 128>}, {pipeline_mode = #tpu.pipeline_mode<synchronous>, transform_indices = @transform_2, window_bounds = array<i64: 1, 128>}, {pipeline_mode = #tpu.pipeline_mode<synchronous>, transform_indices = @transform_3, window_bounds = array<i64: 128, 8>}, {pipeline_mode = #tpu.pipeline_mode<synchronous>, transform_indices = @transform_4, window_bounds = array<i64: 1, 8>}, {transform_indices = @transform_5, window_bounds = array<i64: 256, 8>}]} {
    %c0 = arith.constant 0 : index
    %c0_0 = arith.constant 0 : index
    %0 = vector.load %arg1[%c0, %c0_0] : memref<256x8xf32, #tpu.memory_space<vmem>>, vector<256x8xf32>
    %1 = arith.truncf %0 : vector<256x8xf32> to vector<256x8xbf16>
    %c0_1 = arith.constant 0 : index
    %c0_2 = arith.constant 0 : index
    %2 = vector.load %arg2[%c0_1, %c0_2] : memref<8x128xbf16, #tpu.memory_space<vmem>>, vector<8x128xbf16>
    %cst = arith.constant dense<0.000000e+00> : vector<256x128xf32>
    %3 = tpu.matmul %1, %2, %cst {dimension_numbers = #tpu.dot_dimension_numbers<[1], [0], [0], [1], [0, 0, 1, 1], [], []>} : vector<256x8xbf16>, vector<8x128xbf16>, vector<256x128xf32> -> vector<256x128xf32>
    %c0_3 = arith.constant 0 : index
    %c0_4 = arith.constant 0 : index
    %4 = vector.load %arg3[%c0_3, %c0_4] : memref<1x128xf32, #tpu.memory_space<vmem>>, vector<1x128xf32>
    %5 = vector.broadcast %4 : vector<1x128xf32> to vector<256x128xf32>
    %6 = arith.addf %3, %5 : vector<256x128xf32>
    %7 = arith.negf %6 : vector<256x128xf32>
    %8 = math.exp %7 : vector<256x128xf32>
    %cst_5 = arith.constant 1.000000e+00 : f32
    %9 = vector.broadcast %cst_5 : f32 to vector<256x128xf32>
    %10 = arith.addf %9, %8 : vector<256x128xf32>
    %11 = arith.divf %9, %10 : vector<256x128xf32>
    %12 = arith.mulf %6, %11 : vector<256x128xf32>
    %13 = arith.truncf %12 : vector<256x128xf32> to vector<256x128xbf16>
    %c0_6 = arith.constant 0 : index
    %c0_7 = arith.constant 0 : index
    %14 = vector.load %arg4[%c0_6, %c0_7] : memref<128x8xbf16, #tpu.memory_space<vmem>>, vector<128x8xbf16>
    %cst_8 = arith.constant dense<0.000000e+00> : vector<256x8xf32>
    %15 = tpu.matmul %13, %14, %cst_8 {dimension_numbers = #tpu.dot_dimension_numbers<[1], [0], [0], [1], [0, 0, 1, 1], [], []>} : vector<256x128xbf16>, vector<128x8xbf16>, vector<256x8xf32> -> vector<256x8xf32>
    %c0_9 = arith.constant 0 : index
    %c0_10 = arith.constant 0 : index
    %16 = vector.load %arg5[%c0_9, %c0_10] : memref<1x8xf32, #tpu.memory_space<vmem>>, vector<1x8xf32>
    %17 = vector.broadcast %16 : vector<1x8xf32> to vector<256x8xf32>
    %18 = arith.addf %15, %17 : vector<256x8xf32>
    %c0_11 = arith.constant 0 : index
    %c0_12 = arith.constant 0 : index
    %19 = vector.load %arg6[%c0_11, %c0_12] : memref<256x8xf32, #tpu.memory_space<vmem>>, vector<256x8xf32>
    tpu.vector_store %arg6[%c0_11, %c0_12], %18 {strides = array<i32>} : memref<256x8xf32, #tpu.memory_space<vmem>>, vector<256x8xf32>,
    return
  }
  func.func @transform_0(%arg0: i32) -> (i32, i32) {
    %c0_i32 = arith.constant 0 : i32
    %c0_i32_0 = arith.constant 0 : i32
    return %arg0, %c0_i32 : i32, i32
  }
  func.func @transform_1(%arg0: i32) -> (i32, i32) {
    %c0_i32 = arith.constant 0 : i32
    %c0_i32_0 = arith.constant 0 : i32
    %c0_i32_1 = arith.constant 0 : i32
    return %c0_i32, %c0_i32_0 : i32, i32
  }
  func.func @transform_2(%arg0: i32) -> (i32, i32) {
    %c0_i32 = arith.constant 0 : i32
    %c0_i32_0 = arith.constant 0 : i32
    %c0_i32_1 = arith.constant 0 : i32
    return %c0_i32, %c0_i32_0 : i32, i32
  }
  func.func @transform_3(%arg0: i32) -> (i32, i32) {
    %c0_i32 = arith.constant 0 : i32
    %c0_i32_0 = arith.constant 0 : i32
    %c0_i32_1 = arith.constant 0 : i32
    return %c0_i32, %c0_i32_0 : i32, i32
  }
  func.func @transform_4(%arg0: i32) -> (i32, i32) {
    %c0_i32 = arith.constant 0 : i32
    %c0_i32_0 = arith.constant 0 : i32
    %c0_i32_1 = arith.constant 0 : i32
    return %c0_i32, %c0_i32_0 : i32, i32
  }
  func.func @transform_5(%arg0: i32) -> (i32, i32) {
    %c0_i32 = arith.constant 0 : i32
    %c0_i32_0 = arith.constant 0 : i32
    return %arg0, %c0_i32 : i32, i32
  }
}

</mosaic_0001>

<bundles_post_ra>
// kernel: _epsnet_forward.1
= control target key start
LH: loop header
LB: loop body
LE: loop exit
PB: predicated region body
PF: predicated region fallthrough
CT: control target
= control target key end

     0   :  { %vm126_vm0 = vcmask 1043456   ;;  %vm77_vm1 = vcmask 64512   ;;  %s1632_s1 = inlined_call_operand.vmem [shape: bf16[8,128], index: 1, kind: input, shape index: {}]   ;;  %s1633_s0 = inlined_call_operand.vmem [shape: f32[256,8], index: 0, kind: input, shape index: {}]   ;;  %s1634_s3 = inlined_call_operand.vmem [shape: bf16[128,8], index: 3, kind: input, shape index: {}]   ;;  %s1635_s2 = inlined_call_operand.vmem [shape: f32[1,128], index: 2, kind: input, shape index: {}]   ;;  %s1636_s4 = inlined_call_operand.vmem [shape: f32[1,8], index: 4, kind: input, shape index: {}]   ;;  %s1637_s5 = inlined_call_operand.vmem [shape: f32[256,8], index: 5, kind: output, shape index: {}]  }
   0x1   :  { %v69_v0 = vld [vmem:[%s1632_s1] sm:$0xf]  ;;  %v22_v2 = vld [vmem:[%s1633_s0 + $0x8] sm:$0xff]  ;;  %v23_v5 = vld [vmem:[%s1633_s0 + $0x10] sm:$0xff] }
   0x2   :  { %v21_v1 = vld [vmem:[%s1633_s0] sm:$0xff]  ;;  %996 = vmatprep.subr.msk.bf16.mxu0 %vm126_vm0, %v69_v0  ;;  %v128_v3 = vsel %vm126_vm0, %v69_v0, 0  ;;  %v24_v6 = vld [vmem:[%s1633_s0 + $0x18] sm:$0xff]  ;;  %v26_v9 = vld [vmem:[%s1633_s0 + $0x28] sm:$0xff] }
   0x3   :  { %v53_v4 = vpack.c.bf16 %v22_v2, %v21_v1  ;;  %v25_v7 = vld [vmem:[%s1633_s0 + $0x20] sm:$0xff]  ;;  %899 = vmatpush3.bf16.msra.mxu0 %v128_v3  ;;  %v54_v8 = vpack.c.bf16 %v24_v6, %v23_v5  ;;  %v27_v11 = vld [vmem:[%s1633_s0 + $0x30] sm:$0xff]  ;;  %v28_v12 = vld [vmem:[%s1633_s0 + $0x38] sm:$0xff] }
   0x4   :  { %v55_v10 = vpack.c.bf16 %v26_v9, %v25_v7  ;;  %v29_v13 = vld [vmem:[%s1633_s0 + $0x40] sm:$0xff]  ;;  %v30_v14 = vld [vmem:[%s1633_s0 + $0x48] sm:$0xff]  ;;  %v56_v15 = vpack.c.bf16 %v28_v12, %v27_v11  ;;  %v31_v17 = vld [vmem:[%s1633_s0 + $0x50] sm:$0xff] }
   0x5   :  { %900 = vmatprep.mubr.msk.bf16.mxu0 %vm77_vm1, %v53_v4  ;;  %v57_v16 = vpack.c.bf16 %v30_v14, %v29_v13  ;;  %v32_v18 = vld [vmem:[%s1633_s0 + $0x58] sm:$0xff]  ;;  %v33_v19 = vld [vmem:[%s1633_s0 + $0x60] sm:$0xff]  ;;  %v34_v20 = vld [vmem:[%s1633_s0 + $0x68] sm:$0xff] }
   0x6   :  { %901 = vmatmul.mubr.msk.bf16.vlgmr.msra.gmra.mxu0 %vm77_vm1, %v54_v8  ;;  %v58_v21 = vpack.c.bf16 %v32_v18, %v31_v17  ;;  %v59_v22 = vpack.c.bf16 %v34_v20, %v33_v19  ;;  %v35_v23 = vld [vmem:[%s1633_s0 + $0x70] sm:$0xff]  ;;  %v36_v24 = vld [vmem:[%s1633_s0 + $0x78] sm:$0xff]  ;;  %v37_v25 = vld [vmem:[%s1633_s0 + $0x80] sm:$0xff] }
   0x7   :  { %904 = vmatprep.mubr.msk.bf16.mxu0 %vm77_vm1, %v55_v10  ;;  %v38_v26 = vld [vmem:[%s1633_s0 + $0x88] sm:$0xff]  ;;  %v60_v27 = vpack.c.bf16 %v36_v24, %v35_v23  ;;  %v39_v29 = vld [vmem:[%s1633_s0 + $0x90] sm:$0xff]  ;;  %v40_v30 = vld [vmem:[%s1633_s0 + $0x98] sm:$0xff] }
   0x8   :  { %v61_v28 = vpack.c.bf16 %v38_v26, %v37_v25  ;;  %v41_v31 = vld [vmem:[%s1633_s0 + $0xa0] sm:$0xff]  ;;  %v42_v32 = vld [vmem:[%s1633_s0 + $0xa8] sm:$0xff]  ;;  %v62_v33 = vpack.c.bf16 %v40_v30, %v39_v29  ;;  %v43_v35 = vld [vmem:[%s1633_s0 + $0xb0] sm:$0xff] }
   0x9   :  { %v63_v34 = vpack.c.bf16 %v42_v32, %v41_v31  ;;  %v44_v36 = vld [vmem:[%s1633_s0 + $0xb8] sm:$0xff]  ;;  %v45_v37 = vld [vmem:[%s1633_s0 + $0xc0] sm:$0xff]  ;;  %v46_v38 = vld [vmem:[%s1633_s0 + $0xc8] sm:$0xff] }
   0xa   :  { %v64_v39 = vpack.c.bf16 %v44_v36, %v43_v35  ;;  %v65_v40 = vpack.c.bf16 %v46_v38, %v45_v37  ;;  %v47_v41 = vld [vmem:[%s1633_s0 + $0xd0] sm:$0xff]  ;;  %v48_v42 = vld [vmem:[%s1633_s0 + $0xd8] sm:$0xff]  ;;  %v49_v43 = vld [vmem:[%s1633_s0 + $0xe0] sm:$0xff] }
   0xb   :  { %v50_v44 = vld [vmem:[%s1633_s0 + $0xe8] sm:$0xff]  ;;  %v66_v45 = vpack.c.bf16 %v48_v42, %v47_v41  ;;  %v51_v47 = vld [vmem:[%s1633_s0 + $0xf0] sm:$0xff]  ;;  %v52_v48 = vld [vmem:[%s1633_s0 + $0xf8] sm:$0xff] }
   0xc   :  { %v67_v46 = vpack.c.bf16 %v50_v44, %v49_v43  ;;  %v68_v49 = vpack.c.bf16 %v52_v48, %v51_v47  ;;  %v997_v50 = vld [vmem:[%s1634_s3 + $0x38] sm:$0xff]   ;;  %v998_v51 = vld [vmem:[%s1634_s3 + $0x30] sm:$0xff]   ;;  %v999_v52 = vld [vmem:[%s1634_s3 + $0x28] sm:$0xff]  }
   0xd   :  { %932 = vmatprep.subr.bf16.mxu0 %v997_v50  ;;  %980 = vmatprep.subr.bf16.mxu1 %v997_v50  ;;  %v1000_v53 = vld [vmem:[%s1634_s3 + $0x20] sm:$0xff]   ;;  %v1001_v54 = vld [vmem:[%s1634_s3 + $0x18] sm:$0xff]   ;;  %v1002_v55 = vld [vmem:[%s1634_s3 + $0x10] sm:$0xff]  }
   0xe   :  { %905 = vmatmul.mubr.msk.bf16.gmra.mxu0 %vm77_vm1, %v56_v15  ;;  %988 = vmatpush3.bf16.msra.mxu1 %v997_v50  ;;  %v1003_v56 = vld [vmem:[%s1634_s3 + $0x8] sm:$0xff]   ;;  %v1004_v57 = vld [vmem:[%s1634_s3] sm:$0xff]  }
   0xf   :  { %908 = vmatprep.mubr.msk.bf16.mxu0 %vm77_vm1, %v57_v16  ;;  %933 = vmatpush3.bf16.msra.mxu0 %v997_v50  ;;  %v1305_v58 = vld [vmem:[%s1635_s2] ss:$0 sm:$0xff] }
  0x10   :  { %934 = vmatprep.subr.bf16.mxu0 %v998_v51  ;;  %981 = vmatprep.subr.bf16.mxu1 %v998_v51 }
  0x12   :  { %989 = vmatpush3.bf16.msra.mxu1 %v998_v51 }
  0x13   :  { %935 = vmatpush3.bf16.msra.mxu0 %v998_v51  ;;  %982 = vmatprep.subr.bf16.mxu1 %v999_v52 }
  0x14   :  { %936 = vmatprep.subr.bf16.mxu0 %v999_v52 }
  0x16   :  { %909 = vmatmul.mubr.msk.bf16.gmra.mxu0 %vm77_vm1, %v58_v21  ;;  %990 = vmatpush3.bf16.msra.mxu1 %v999_v52 }
  0x17   :  { %912 = vmatprep.mubr.msk.bf16.mxu0 %vm77_vm1, %v59_v22  ;;  %937 = vmatpush3.bf16.msra.mxu0 %v999_v52 }
  0x18   :  { %938 = vmatprep.subr.bf16.mxu0 %v1000_v53  ;;  %983 = vmatprep.subr.bf16.mxu1 %v1000_v53 }
  0x1a   :  { %991 = vmatpush3.bf16.msra.mxu1 %v1000_v53 }
  0x1b   :  { %939 = vmatpush3.bf16.msra.mxu0 %v1000_v53  ;;  %984 = vmatprep.subr.bf16.mxu1 %v1001_v54 }
  0x1c   :  { %940 = vmatprep.subr.bf16.mxu0 %v1001_v54 }
  0x1e   :  { %913 = vmatmul.mubr.msk.bf16.gmra.mxu0 %vm77_vm1, %v60_v27  ;;  %992 = vmatpush3.bf16.msra.mxu1 %v1001_v54 }
  0x1f   :  { %916 = vmatprep.mubr.msk.bf16.mxu0 %vm77_vm1, %v61_v28  ;;  %941 = vmatpush3.bf16.msra.mxu0 %v1001_v54 }
  0x20   :  { %942 = vmatprep.subr.bf16.mxu0 %v1002_v55  ;;  %985 = vmatprep.subr.bf16.mxu1 %v1002_v55 }
  0x22   :  { %993 = vmatpush3.bf16.msra.mxu1 %v1002_v55 }
  0x23   :  { %943 = vmatpush3.bf16.msra.mxu0 %v1002_v55  ;;  %986 = vmatprep.subr.bf16.mxu1 %v1003_v56 }
  0x24   :  { %944 = vmatprep.subr.bf16.mxu0 %v1003_v56 }
  0x26   :  { %917 = vmatmul.mubr.msk.bf16.gmra.mxu0 %vm77_vm1, %v62_v33  ;;  %994 = vmatpush3.bf16.msra.mxu1 %v1003_v56 }
  0x27   :  { %920 = vmatprep.mubr.msk.bf16.mxu0 %vm77_vm1, %v63_v34  ;;  %945 = vmatpush3.bf16.msra.mxu0 %v1003_v56 }
  0x28   :  { %946 = vmatprep.subr.bf16.mxu0 %v1004_v57  ;;  %987 = vmatprep.subr.bf16.mxu1 %v1004_v57 }
  0x2a   :  { %995 = vmatpush3.bf16.msra.mxu1 %v1004_v57 }
  0x2b   :  { %947 = vmatpush3.bf16.msra.mxu0 %v1004_v57 }
  0x2e   :  { %921 = vmatmul.mubr.msk.bf16.gmra.mxu0 %vm77_vm1, %v64_v39 }
  0x2f   :  { %924 = vmatprep.mubr.msk.bf16.mxu0 %vm77_vm1, %v65_v40 }
  0x36   :  { %925 = vmatmul.mubr.msk.bf16.gmra.mxu0 %vm77_vm1, %v66_v45 }
  0x37   :  { %928 = vmatprep.mubr.msk.bf16.mxu0 %vm77_vm1, %v67_v46 }
  0x3e   :  { %929 = vmatmul.mubr.msk.bf16.gmra.mxu0 %vm77_vm1, %v68_v49 }
  0xc6   :  { %v902_v59 = vpop.f32.mrf.mxu0 }
  0xc7   :  { %v1308_v60 = vadd.f32 %v902_v59, %v1305_v58 }
  0xc8   :  { %v164_v61 = vpop.f32.mrf.mxu0 }
  0xc9   :  { %v818_v62 = vmul.f32 -1.442695, %v1308_v60  ;;  %v1312_v63 = vadd.f32 %v1305_v58, %v164_v61 }
  0xca   :  { %v903_v0 = vpop.f32.mrf.mxu0 }
  0xcb   :  { %1005 = vpow2.f32 %v818_v62  ;;  %v816_v1 = vmul.f32 -1.442695, %v1312_v63  ;;  %v1316_v2 = vadd.f32 %v903_v0, %v1305_v58 }
  0xcc   :  { %v167_v3 = vpop.f32.mrf.mxu0 }
  0xcd   :  { %1007 = vpow2.f32 %v816_v1  ;;  %v819_v4 = vmul.f32 -1.442695, %v1316_v2  ;;  %v1320_v5 = vadd.f32 %v1305_v58, %v167_v3 }
  0xce   :  { %v906_v6 = vpop.f32.mrf.mxu0 }
  0xcf   :  { %1009 = vpow2.f32 %v819_v4  ;;  %v817_v7 = vmul.f32 -1.442695, %v1320_v5  ;;  %v1324_v8 = vadd.f32 %v906_v6, %v1305_v58 }
  0xd0   :  { %v180_v9 = vpop.f32.mrf.mxu0 }
  0xd1   :  { %1011 = vpow2.f32 %v817_v7  ;;  %v822_v10 = vmul.f32 -1.442695, %v1324_v8  ;;  %v1328_v11 = vadd.f32 %v1305_v58, %v180_v9 }
  0xd2   :  { %v907_v12 = vpop.f32.mrf.mxu0 }
  0xd3   :  { %1013 = vpow2.f32 %v822_v10  ;;  %v820_v13 = vmul.f32 -1.442695, %v1328_v11  ;;  %v1332_v14 = vadd.f32 %v907_v12, %v1305_v58 }
  0xd4   :  { %v183_v15 = vpop.f32.mrf.mxu0 }
  0xd5   :  { %1015 = vpow2.f32 %v820_v13  ;;  %v823_v16 = vmul.f32 -1.442695, %v1332_v14  ;;  %v1336_v17 = vadd.f32 %v1305_v58, %v183_v15 }
  0xd6   :  { %v910_v18 = vpop.f32.mrf.mxu0 }
  0xd7   :  { %1017 = vpow2.f32 %v823_v16  ;;  %v821_v19 = vmul.f32 -1.442695, %v1336_v17  ;;  %v1340_v20 = vadd.f32 %v910_v18, %v1305_v58 }
  0xd8   :  { %v1006_v21 = vpop.eup %1005  ;;  %v196_v22 = vpop.f32.mrf.mxu0 }
  0xd9   :  { %v389_v23 = vadd.f32 1.0, %v1006_v21  ;;  %1019 = vpow2.f32 %v821_v19  ;;  %v826_v24 = vmul.f32 -1.442695, %v1340_v20  ;;  %v1344_v25 = vadd.f32 %v1305_v58, %v196_v22 }
  0xda   :  { %v1008_v26 = vpop.eup %1007  ;;  %v911_v27 = vpop.f32.mrf.mxu0 }
  0xdb   :  { %1021 = vrcp.f32 %v389_v23  ;;  %v387_v28 = vadd.f32 1.0, %v1008_v26  ;;  %v824_v29 = vmul.f32 -1.442695, %v1344_v25  ;;  %v1348_v30 = vadd.f32 %v911_v27, %v1305_v58 }
  0xdc   :  { %v1010_v31 = vpop.eup %1009  ;;  %1023 = vpow2.f32 %v826_v24  ;;  %v199_v32 = vpop.f32.mrf.mxu0 }
  0xdd   :  { %1025 = vrcp.f32 %v387_v28  ;;  %v390_v33 = vadd.f32 1.0, %v1010_v31  ;;  %v827_v34 = vmul.f32 -1.442695, %v1348_v30  ;;  %v1352_v35 = vadd.f32 %v1305_v58, %v199_v32 }
  0xde   :  { %v1012_v36 = vpop.eup %1011  ;;  %1027 = vpow2.f32 %v824_v29  ;;  %v914_v37 = vpop.f32.mrf.mxu0 }
  0xdf   :  { %1029 = vrcp.f32 %v390_v33  ;;  %v388_v38 = vadd.f32 1.0, %v1012_v36  ;;  %v825_v39 = vmul.f32 -1.442695, %v1352_v35  ;;  %v1356_v40 = vadd.f32 %v914_v37, %v1305_v58 }
  0xe0   :  { %v1014_v41 = vpop.eup %1013  ;;  %1031 = vpow2.f32 %v827_v34  ;;  %v212_v42 = vpop.f32.mrf.mxu0 }
  0xe1   :  { %1033 = vrcp.f32 %v388_v38  ;;  %v393_v43 = vadd.f32 1.0, %v1014_v41  ;;  %v830_v44 = vmul.f32 -1.442695, %v1356_v40  ;;  %v1360_v45 = vadd.f32 %v1305_v58, %v212_v42 }
  0xe2   :  { %v1016_v46 = vpop.eup %1015  ;;  %1035 = vpow2.f32 %v825_v39  ;;  %v915_v47 = vpop.f32.mrf.mxu0 }
  0xe3   :  { %1037 = vrcp.f32 %v393_v43  ;;  %v391_v48 = vadd.f32 1.0, %v1016_v46  ;;  %v828_v49 = vmul.f32 -1.442695, %v1360_v45  ;;  %v1364_v50 = vadd.f32 %v915_v47, %v1305_v58 }
  0xe4   :  { %v1018_v51 = vpop.eup %1017  ;;  %1039 = vpow2.f32 %v830_v44  ;;  %v215_v52 = vpop.f32.mrf.mxu0 }
  0xe5   :  { %1041 = vrcp.f32 %v391_v48  ;;  %v394_v53 = vadd.f32 1.0, %v1018_v51  ;;  %v831_v54 = vmul.f32 -1.442695, %v1364_v50  ;;  %v1368_v55 = vadd.f32 %v1305_v58, %v215_v52 }
  0xe6   :  { %v1020_v56 = vpop.eup %1019  ;;  %1043 = vpow2.f32 %v828_v49  ;;  %v918_v57 = vpop.f32.mrf.mxu0 }
  0xe7   :  { %1045 = vrcp.f32 %v394_v53  ;;  %v392_v59 = vadd.f32 1.0, %v1020_v56  ;;  %v829_v61 = vmul.f32 -1.442695, %v1368_v55  ;;  %v1372_v62 = vadd.f32 %v918_v57, %v1305_v58 }
  0xe8   :  { %v1022_v0 = vpop.eup %1021  ;;  %1047 = vpow2.f32 %v831_v54  ;;  %v228_v1 = vpop.f32.mrf.mxu0 }
  0xe9   :  { %v1024_v3 = vpop.eup %1023  ;;  %1049 = vrcp.f32 %v392_v59  ;;  %v834_v4 = vmul.f32 -1.442695, %v1372_v62  ;;  %v1376_v6 = vadd.f32 %v1305_v58, %v228_v1  ;;  %v485_v36 = vmul.f32 %v1022_v0, %v1308_v60 }
  0xea   :  { %v1026_v7 = vpop.eup %1025  ;;  %v397_v9 = vadd.f32 1.0, %v1024_v3  ;;  %1051 = vpow2.f32 %v829_v61  ;;  %v919_v10 = vpop.f32.mrf.mxu0 }
  0xeb   :  { %v1028_v12 = vpop.eup %1027  ;;  %1053 = vpow2.f32 %v834_v4  ;;  %v832_v13 = vmul.f32 -1.442695, %v1376_v6  ;;  %v1380_v15 = vadd.f32 %v919_v10, %v1305_v58  ;;  %v483_v31 = vmul.f32 %v1026_v7, %v1312_v63 }
  0xec   :  { %v1030_v16 = vpop.eup %1029  ;;  %1055 = vrcp.f32 %v397_v9  ;;  %v395_v18 = vadd.f32 1.0, %v1028_v12  ;;  %v231_v19 = vpop.f32.mrf.mxu0 }
  0xed   :  { %v1032_v21 = vpop.eup %1031  ;;  %1057 = vpow2.f32 %v832_v13  ;;  %v835_v22 = vmul.f32 -1.442695, %v1380_v15  ;;  %v1384_v23 = vadd.f32 %v1305_v58, %v231_v19  ;;  %v486_v26 = vmul.f32 %v1030_v16, %v1316_v2 }
  0xee   :  { %v1034_v24 = vpop.eup %1033  ;;  %1059 = vrcp.f32 %v395_v18  ;;  %v398_v27 = vadd.f32 1.0, %v1032_v21  ;;  %v922_v28 = vpop.f32.mrf.mxu0 }
  0xef   :  { %v1036_v29 = vpop.eup %1035  ;;  %v484_v32 = vmul.f32 %v1034_v24, %v1320_v5  ;;  %1061 = vpow2.f32 %v835_v22  ;;  %v833_v33 = vmul.f32 -1.442695, %v1384_v23  ;;  %v1392_v38 = vadd.f32 %v922_v28, %v1305_v58 }
  0xf0   :  { %v1038_v34 = vpop.eup %1037  ;;  %1063 = vrcp.f32 %v398_v27  ;;  %v396_v37 = vadd.f32 1.0, %v1036_v29  ;;  %v244_v2 = vpop.f32.mrf.mxu0  ;;  %v516_v5 = vpack.c.bf16 %v486_v26, %v485_v36 }
  0xf1   :  { %v1040_v39 = vpop.eup %1039  ;;  %1065 = vpow2.f32 %v833_v33  ;;  %v1395_v41 = vadd.f32 %v1305_v58, %v244_v2  ;;  %v515_v63 = vpack.c.bf16 %v484_v32, %v483_v31  ;;  %v838_v44 = vmul.f32 -1.442695, %v1392_v38 }
  0xf2   :  { %v1042_v42 = vpop.eup %1041  ;;  %1067 = vrcp.f32 %v396_v37  ;;  %v401_v43 = vadd.f32 1.0, %v1040_v39  ;;  %v923_v46 = vpop.f32.mrf.mxu0  ;;  %v489_v18 = vmul.f32 %v1038_v34, %v1324_v8 }
  0xf3   :  { %v1044_v60 = vpop.eup %1043  ;;  %v836_v47 = vmul.f32 -1.442695, %v1395_v41  ;;  %v1400_v48 = vadd.f32 %v923_v46, %v1305_v58  ;;  %948 = vmatprep.mubr.bf16.mxu0 %v515_v63  ;;  %v487_v13 = vmul.f32 %v1042_v42, %v1328_v11 }
  0xf4   :  { %v1046_v49 = vpop.eup %1045  ;;  %1069 = vrcp.f32 %v401_v43  ;;  %v399_v51 = vadd.f32 1.0, %v1044_v60  ;;  %v247_v52 = vpop.f32.mrf.mxu0  ;;  %949 = vmatmul.mubr.bf16.vlgmr.msra.gmra.mxu0 %v516_v5 }
  0xf5   :  { %v1048_v53 = vpop.eup %1047  ;;  %1071 = vpow2.f32 %v838_v44  ;;  %v839_v54 = vmul.f32 -1.442695, %v1400_v48  ;;  %v1404_v56 = vadd.f32 %v1305_v58, %v247_v52  ;;  %v490_v1 = vmul.f32 %v1046_v49, %v1332_v14 }
  0xf6   :  { %v1050_v57 = vpop.eup %1049  ;;  %1073 = vrcp.f32 %v399_v51  ;;  %v402_v59 = vadd.f32 1.0, %v1048_v53  ;;  %v926_v61 = vpop.f32.mrf.mxu0 }
  0xf7   :  { %v1052_v0 = vpop.eup %1051  ;;  %1075 = vpow2.f32 %v836_v47  ;;  %v1408_v3 = vadd.f32 %v926_v61, %v1305_v58  ;;  %v488_v4 = vmul.f32 %v1050_v57, %v1336_v17  ;;  %v837_v10 = vmul.f32 -1.442695, %v1404_v56 }
  0xf8   :  { %v1054_v7 = vpop.eup %1053  ;;  %1077 = vrcp.f32 %v402_v59  ;;  %v400_v9 = vadd.f32 1.0, %v1052_v0  ;;  %v260_v12 = vpop.f32.mrf.mxu0  ;;  %v518_v11 = vpack.c.bf16 %v490_v1, %v489_v18 }
  0xf9   :  { %v1056_v16 = vpop.eup %1055  ;;  %v405_v19 = vadd.f32 1.0, %v1054_v7  ;;  %1079 = vpow2.f32 %v839_v54  ;;  %v1415_v14 = vadd.f32 %v1305_v58, %v260_v12  ;;  %v842_v17 = vmul.f32 -1.442695, %v1408_v3 }
  0xfa   :  { %v1058_v21 = vpop.eup %1057  ;;  %1081 = vrcp.f32 %v400_v9  ;;  %v927_v22 = vpop.f32.mrf.mxu0  ;;  %v517_v24 = vpack.c.bf16 %v488_v4, %v487_v13 }
  0xfb   :  { %v1060_v26 = vpop.eup %1059  ;;  %1083 = vrcp.f32 %v405_v19  ;;  %v403_v27 = vadd.f32 1.0, %v1058_v21  ;;  %v1419_v28 = vadd.f32 %v927_v22, %v1305_v58  ;;  %v840_v8 = vmul.f32 -1.442695, %v1415_v14 }
  0xfc   :  { %v1062_v29 = vpop.eup %1061  ;;  %1085 = vpow2.f32 %v837_v10  ;;  %952 = vmatprep.mubr.bf16.mxu1 %v517_v24  ;;  %v263_v31 = vpop.f32.mrf.mxu0  ;;  %v491_v44 = vmul.f32 %v1060_v26, %v1344_v25 }
  0xfd   :  { %v1064_v32 = vpop.eup %1063  ;;  %1087 = vrcp.f32 %v403_v27  ;;  %v406_v33 = vadd.f32 1.0, %v1062_v29  ;;  %v1423_v34 = vadd.f32 %v1305_v58, %v263_v31  ;;  %953 = vmatmul.mubr.bf16.vlgmr.msra.gmra.mxu1 %v518_v11  ;;  %v843_v2 = vmul.f32 -1.442695, %v1419_v28 }
  0xfe   :  { %v1066_v36 = vpop.eup %1065  ;;  %v494_v37 = vmul.f32 %v1064_v32, %v1348_v30  ;;  %1089 = vpow2.f32 %v842_v17  ;;  %v930_v39 = vpop.f32.mrf.mxu0  ;;  %v493_v30 = vmul.f32 %v1056_v16, %v1340_v20 }
  0xff   :  { %v1068_v63 = vpop.eup %1067  ;;  %1091 = vrcp.f32 %v406_v33  ;;  %v404_v42 = vadd.f32 1.0, %v1066_v36  ;;  %v841_v5 = vmul.f32 -1.442695, %v1423_v34  ;;  %v1429_v43 = vadd.f32 %v930_v39, %v1305_v58 }
 0x100   :  { %v492_v46 = vmul.f32 %v1068_v63, %v1352_v35  ;;  %1093 = vpow2.f32 %v840_v8  ;;  %v276_v60 = vpop.f32.mrf.mxu0  ;;  %v520_v59 = vpack.c.bf16 %v494_v37, %v493_v30 }
 0x101   :  { %v1070_v47 = vpop.eup %1069  ;;  %1095 = vrcp.f32 %v404_v42  ;;  %v846_v49 = vmul.f32 -1.442695, %v1429_v43  ;;  %v1436_v51 = vadd.f32 %v1305_v58, %v276_v60 }
 0x102   :  { %v1072_v52 = vpop.eup %1071  ;;  %1097 = vpow2.f32 %v843_v2  ;;  %v931_v53 = vpop.f32.mrf.mxu0  ;;  %v519_v54 = vpack.c.bf16 %v492_v46, %v491_v44 }
 0x103   :  { %v1074_v57 = vpop.eup %1073  ;;  %1099 = vpow2.f32 %v841_v5  ;;  %v844_v25 = vmul.f32 -1.442695, %v1436_v51  ;;  %v1440_v35 = vadd.f32 %v931_v53, %v1305_v58  ;;  %v409_v10 = vadd.f32 1.0, %v1072_v52 }
 0x104   :  { %v1076_v61 = vpop.eup %1075  ;;  %956 = vmatprep.mubr.bf16.mxu1 %v519_v54  ;;  %v279_v20 = vpop.f32.mrf.mxu0  ;;  %1101 = vpow2.f32 %v846_v49  ;;  %v495_v21 = vmul.f32 %v1074_v57, %v1360_v45 }
 0x105   :  { %v1078_v0 = vpop.eup %1077  ;;  %v407_v1 = vadd.f32 1.0, %v1076_v61  ;;  %v847_v4 = vmul.f32 -1.442695, %v1440_v35  ;;  %v1444_v7 = vadd.f32 %v1305_v58, %v279_v20  ;;  %957 = vmatmul.mubr.bf16.gmra.mxu1 %v520_v59  ;;  %1103 = vpow2.f32 %v844_v25 }
 0x106   :  { %v1080_v9 = vpop.eup %1079  ;;  %v498_v13 = vmul.f32 %v1078_v0, %v1364_v50  ;;  %v497_v58 = vmul.f32 %v1070_v47, %v1356_v40 }
 0x107   :  { %v1082_v12 = vpop.eup %1081  ;;  %1105 = vrcp.f32 %v407_v1  ;;  %v410_v16 = vadd.f32 1.0, %v1080_v9  ;;  %v845_v18 = vmul.f32 -1.442695, %v1444_v7 }
 0x108   :  { %v1084_v19 = vpop.eup %1083  ;;  %v496_v17 = vmul.f32 %v1082_v12, %v1368_v55  ;;  %1107 = vpow2.f32 %v847_v4  ;;  %v522_v50 = vpack.c.bf16 %v498_v13, %v497_v58 }
 0x109   :  { %v1086_v22 = vpop.eup %1085  ;;  %1109 = vrcp.f32 %v410_v16  ;;  %v501_v39 = vmul.f32 %v1084_v19, %v1372_v62 }
 0x10a   :  { %v1088_v24 = vpop.eup %1087  ;;  %v408_v26 = vadd.f32 1.0, %v1086_v22  ;;  %1111 = vpow2.f32 %v845_v18  ;;  %v521_v27 = vpack.c.bf16 %v496_v17, %v495_v21 }
 0x10b   :  { %v1090_v11 = vpop.eup %1089  ;;  %1113 = vrcp.f32 %v409_v10  ;;  %v499_v33 = vmul.f32 %v1088_v24, %v1376_v6 }
 0x10c   :  { %v1092_v29 = vpop.eup %1091  ;;  %1115 = vrcp.f32 %v408_v26  ;;  %v413_v8 = vadd.f32 1.0, %v1090_v11  ;;  %960 = vmatprep.mubr.bf16.mxu1 %v521_v27 }
 0x10d   :  { %v1094_v31 = vpop.eup %1093  ;;  %961 = vmatmul.mubr.bf16.gmra.mxu1 %v522_v50  ;;  %v502_v40 = vmul.f32 %v1092_v29, %v1380_v15 }
 0x10e   :  { %v1096_v45 = vpop.eup %1095  ;;  %v411_v55 = vadd.f32 1.0, %v1094_v31  ;;  %1117 = vrcp.f32 %v413_v8 }
 0x10f   :  { %v1098_v32 = vpop.eup %1097  ;;  %v500_v36 = vmul.f32 %v1096_v45, %v1384_v23  ;;  %v524_v46 = vpack.c.bf16 %v502_v40, %v501_v39 }
 0x110   :  { %v1100_v37 = vpop.eup %1099  ;;  %v414_v2 = vadd.f32 1.0, %v1098_v32  ;;  %1119 = vrcp.f32 %v411_v55 }
 0x111   :  { %v412_v63 = vadd.f32 1.0, %v1100_v37  ;;  %v523_v42 = vpack.c.bf16 %v500_v36, %v499_v33  ;;  %v1102_v5 = vpop.eup %1101 }
 0x112   :  { %1121 = vrcp.f32 %v414_v2  ;;  %v1104_v44 = vpop.eup %1103  ;;  %v417_v49 = vadd.f32 1.0, %v1102_v5 }
 0x113   :  { %1123 = vrcp.f32 %v412_v63  ;;  %964 = vmatprep.mubr.bf16.mxu1 %v523_v42  ;;  %v415_v6 = vadd.f32 1.0, %v1104_v44 }
 0x114   :  { %v1106_v60 = vpop.eup %1105 }
 0x115   :  { %v1108_v47 = vpop.eup %1107  ;;  %965 = vmatmul.mubr.bf16.gmra.mxu1 %v524_v46  ;;  %1125 = vrcp.f32 %v415_v6  ;;  %v503_v57 = vmul.f32 %v1106_v60, %v1395_v41 }
 0x116   :  { %v1110_v15 = vpop.eup %1109  ;;  %v418_v23 = vadd.f32 1.0, %v1108_v47 }
 0x117   :  { %v1112_v30 = vpop.eup %1111  ;;  %v506_v54 = vmul.f32 %v1110_v15, %v1400_v48 }
 0x118   :  { %v1114_v52 = vpop.eup %1113  ;;  %v416_v62 = vadd.f32 1.0, %v1112_v30  ;;  %1127 = vrcp.f32 %v418_v23 }
 0x119   :  { %v1116_v53 = vpop.eup %1115  ;;  %v505_v59 = vmul.f32 %v1114_v52, %v1392_v38 }
 0x11a   :  { %v504_v25 = vmul.f32 %v1116_v53, %v1404_v56  ;;  %1129 = vrcp.f32 %v416_v62 }
 0x11b   :  { %1131 = vrcp.f32 %v417_v49  ;;  %v1118_v20 = vpop.eup %1117  ;;  %v526_v0 = vpack.c.bf16 %v506_v54, %v505_v59 }
 0x11c   :  { %v525_v61 = vpack.c.bf16 %v504_v25, %v503_v57  ;;  %v509_v56 = vmul.f32 %v1118_v20, %v1408_v3  ;;  %v1470_v3 = vld [vmem:[%s1636_s4] ss:$0 sm:$0xff] }
 0x11d   :  { %v1120_v1 = vpop.eup %1119 }
 0x11e   :  { %968 = vmatprep.mubr.bf16.mxu1 %v525_v61  ;;  %v507_v10 = vmul.f32 %v1120_v1, %v1415_v14 }
 0x11f   :  { %v1122_v4 = vpop.eup %1121  ;;  %969 = vmatmul.mubr.bf16.gmra.mxu1 %v526_v0 }
 0x120   :  { %v1124_v9 = vpop.eup %1123  ;;  %v510_v48 = vmul.f32 %v1122_v4, %v1419_v28 }
 0x121   :  { %v508_v41 = vmul.f32 %v1124_v9, %v1423_v34 }
 0x122   :  { %v1126_v13 = vpop.eup %1125  ;;  %v528_v38 = vpack.c.bf16 %v510_v48, %v509_v56 }
 0x123   :  { %v527_v12 = vpack.c.bf16 %v508_v41, %v507_v10  ;;  %v511_v21 = vmul.f32 %v1126_v13, %v1436_v51 }
 0x125   :  { %972 = vmatprep.mubr.bf16.mxu1 %v527_v12  ;;  %v1128_v16 = vpop.eup %1127 }
 0x126   :  { %v514_v14 = vmul.f32 %v1128_v16, %v1440_v35 }
 0x127   :  { %v1130_v18 = vpop.eup %1129  ;;  %973 = vmatmul.mubr.bf16.gmra.mxu1 %v528_v38 }
 0x128   :  { %v1132_v19 = vpop.eup %1131  ;;  %v512_v17 = vmul.f32 %v1130_v18, %v1444_v7 }
 0x129   :  { %v513_v28 = vmul.f32 %v1132_v19, %v1429_v43 }
 0x12a   :  { %v529_v22 = vpack.c.bf16 %v512_v17, %v511_v21 }
 0x12b   :  { %v530_v34 = vpack.c.bf16 %v514_v14, %v513_v28 }
 0x12c   :  { %976 = vmatprep.mubr.bf16.mxu1 %v529_v22 }
 0x12f   :  { %977 = vmatmul.mubr.bf16.gmra.mxu1 %v530_v34 }
 0x1b4   :  { %v950_v58 = vpop.f32.mrf.mxu0 }
 0x1b5   :  { %v645_v24 = vadd.f32 %v950_v58, %v1470_v3 }
 0x1b6   :  { %v636_v26 = vpop.f32.mrf.mxu0 }
 0x1b7   :  { %765 = vst.msk [vmem:[%s1637_s5 + $0x10] sm:$0xff] %vm77_vm1, %v645_v24  ;;  %v637_v51 = vadd.f32 %v1470_v3, %v636_v26 }
 0x1b8   :  { %v951_v43 = vpop.f32.mrf.mxu0 }
 0x1b9   :  { %763 = vst.msk [vmem:[%s1637_s5] sm:$0xff] %vm77_vm1, %v637_v51  ;;  %v648_v35 = vadd.f32 %v951_v43, %v1470_v3 }
 0x1ba   :  { %v639_v7 = vpop.f32.mrf.mxu0 }
 0x1bb   :  { %766 = vst.msk [vmem:[%s1637_s5 + $0x18] sm:$0xff] %vm77_vm1, %v648_v35  ;;  %v640_v27 = vadd.f32 %v1470_v3, %v639_v7 }
 0x1bd   :  { %764 = vst.msk [vmem:[%s1637_s5 + $0x8] sm:$0xff] %vm77_vm1, %v640_v27  ;;  %v954_v11 = vpop.f32.mrf.mxu1 }
 0x1be   :  { %v661_v50 = vadd.f32 %v954_v11, %v1470_v3 }
 0x1bf   :  { %v652_v29 = vpop.f32.mrf.mxu1 }
 0x1c0   :  { %769 = vst.msk [vmem:[%s1637_s5 + $0x30] sm:$0xff] %vm77_vm1, %v661_v50  ;;  %v653_v8 = vadd.f32 %v1470_v3, %v652_v29 }
 0x1c1   :  { %v955_v31 = vpop.f32.mrf.mxu1 }
 0x1c2   :  { %767 = vst.msk [vmem:[%s1637_s5 + $0x20] sm:$0xff] %vm77_vm1, %v653_v8  ;;  %v664_v45 = vadd.f32 %v955_v31, %v1470_v3 }
 0x1c3   :  { %v655_v55 = vpop.f32.mrf.mxu1 }
 0x1c4   :  { %770 = vst.msk [vmem:[%s1637_s5 + $0x38] sm:$0xff] %vm77_vm1, %v664_v45  ;;  %v656_v32 = vadd.f32 %v1470_v3, %v655_v55 }
 0x1c5   :  { %v958_v33 = vpop.f32.mrf.mxu1 }
 0x1c6   :  { %768 = vst.msk [vmem:[%s1637_s5 + $0x28] sm:$0xff] %vm77_vm1, %v656_v32  ;;  %v677_v40 = vadd.f32 %v958_v33, %v1470_v3 }
 0x1c7   :  { %v668_v36 = vpop.f32.mrf.mxu1 }
 0x1c8   :  { %773 = vst.msk [vmem:[%s1637_s5 + $0x50] sm:$0xff] %vm77_vm1, %v677_v40  ;;  %v669_v37 = vadd.f32 %v1470_v3, %v668_v36 }
 0x1c9   :  { %v959_v2 = vpop.f32.mrf.mxu1 }
 0x1ca   :  { %771 = vst.msk [vmem:[%s1637_s5 + $0x40] sm:$0xff] %vm77_vm1, %v669_v37  ;;  %v680_v39 = vadd.f32 %v959_v2, %v1470_v3 }
 0x1cb   :  { %v671_v63 = vpop.f32.mrf.mxu1 }
 0x1cc   :  { %774 = vst.msk [vmem:[%s1637_s5 + $0x58] sm:$0xff] %vm77_vm1, %v680_v39  ;;  %v672_v42 = vadd.f32 %v1470_v3, %v671_v63 }
 0x1cd   :  { %v962_v5 = vpop.f32.mrf.mxu1 }
 0x1ce   :  { %772 = vst.msk [vmem:[%s1637_s5 + $0x48] sm:$0xff] %vm77_vm1, %v672_v42  ;;  %v693_v44 = vadd.f32 %v962_v5, %v1470_v3 }
 0x1cf   :  { %v684_v46 = vpop.f32.mrf.mxu1 }
 0x1d0   :  { %777 = vst.msk [vmem:[%s1637_s5 + $0x70] sm:$0xff] %vm77_vm1, %v693_v44  ;;  %v685_v60 = vadd.f32 %v1470_v3, %v684_v46 }
 0x1d1   :  { %v963_v6 = vpop.f32.mrf.mxu1 }
 0x1d2   :  { %775 = vst.msk [vmem:[%s1637_s5 + $0x60] sm:$0xff] %vm77_vm1, %v685_v60  ;;  %v696_v47 = vadd.f32 %v963_v6, %v1470_v3 }
 0x1d3   :  { %v687_v15 = vpop.f32.mrf.mxu1 }
 0x1d4   :  { %778 = vst.msk [vmem:[%s1637_s5 + $0x78] sm:$0xff] %vm77_vm1, %v696_v47  ;;  %v688_v23 = vadd.f32 %v1470_v3, %v687_v15 }
 0x1d5   :  { %v966_v30 = vpop.f32.mrf.mxu1 }
 0x1d6   :  { %776 = vst.msk [vmem:[%s1637_s5 + $0x68] sm:$0xff] %vm77_vm1, %v688_v23  ;;  %v709_v49 = vadd.f32 %v966_v30, %v1470_v3 }
 0x1d7   :  { %v700_v52 = vpop.f32.mrf.mxu1 }
 0x1d8   :  { %781 = vst.msk [vmem:[%s1637_s5 + $0x90] sm:$0xff] %vm77_vm1, %v709_v49  ;;  %v701_v62 = vadd.f32 %v1470_v3, %v700_v52 }
 0x1d9   :  { %v967_v53 = vpop.f32.mrf.mxu1 }
 0x1da   :  { %779 = vst.msk [vmem:[%s1637_s5 + $0x80] sm:$0xff] %vm77_vm1, %v701_v62  ;;  %v712_v54 = vadd.f32 %v967_v53, %v1470_v3 }
 0x1db   :  { %v703_v57 = vpop.f32.mrf.mxu1 }
 0x1dc   :  { %782 = vst.msk [vmem:[%s1637_s5 + $0x98] sm:$0xff] %vm77_vm1, %v712_v54  ;;  %v704_v25 = vadd.f32 %v1470_v3, %v703_v57 }
 0x1de   :  { %780 = vst.msk [vmem:[%s1637_s5 + $0x88] sm:$0xff] %vm77_vm1, %v704_v25 }
 0x1df   :  { %v970_v59 = vpop.f32.mrf.mxu1 }
 0x1e0   :  { %v725_v61 = vadd.f32 %v970_v59, %v1470_v3 }
 0x1e1   :  { %v716_v20 = vpop.f32.mrf.mxu1 }
 0x1e2   :  { %785 = vst.msk [vmem:[%s1637_s5 + $0xb0] sm:$0xff] %vm77_vm1, %v725_v61  ;;  %v717_v0 = vadd.f32 %v1470_v3, %v716_v20 }
 0x1e3   :  { %v971_v1 = vpop.f32.mrf.mxu1 }
 0x1e4   :  { %783 = vst.msk [vmem:[%s1637_s5 + $0xa0] sm:$0xff] %vm77_vm1, %v717_v0  ;;  %v728_v4 = vadd.f32 %v971_v1, %v1470_v3 }
 0x1e5   :  { %v719_v9 = vpop.f32.mrf.mxu1 }
 0x1e6   :  { %786 = vst.msk [vmem:[%s1637_s5 + $0xb8] sm:$0xff] %vm77_vm1, %v728_v4  ;;  %v720_v10 = vadd.f32 %v1470_v3, %v719_v9 }
 0x1e7   :  { %v974_v48 = vpop.f32.mrf.mxu1 }
 0x1e8   :  { %784 = vst.msk [vmem:[%s1637_s5 + $0xa8] sm:$0xff] %vm77_vm1, %v720_v10  ;;  %v741_v41 = vadd.f32 %v974_v48, %v1470_v3 }
 0x1e9   :  { %v732_v56 = vpop.f32.mrf.mxu1 }
 0x1ea   :  { %789 = vst.msk [vmem:[%s1637_s5 + $0xd0] sm:$0xff] %vm77_vm1, %v741_v41  ;;  %v733_v12 = vadd.f32 %v1470_v3, %v732_v56 }
 0x1eb   :  { %v975_v13 = vpop.f32.mrf.mxu1 }
 0x1ec   :  { %787 = vst.msk [vmem:[%s1637_s5 + $0xc0] sm:$0xff] %vm77_vm1, %v733_v12  ;;  %v744_v38 = vadd.f32 %v975_v13, %v1470_v3 }
 0x1ed   :  { %v735_v16 = vpop.f32.mrf.mxu1 }
 0x1ee   :  { %790 = vst.msk [vmem:[%s1637_s5 + $0xd8] sm:$0xff] %vm77_vm1, %v744_v38  ;;  %v736_v18 = vadd.f32 %v1470_v3, %v735_v16 }
 0x1ef   :  { %v978_v19 = vpop.f32.mrf.mxu1 }
 0x1f0   :  { %788 = vst.msk [vmem:[%s1637_s5 + $0xc8] sm:$0xff] %vm77_vm1, %v736_v18  ;;  %v757_v21 = vadd.f32 %v978_v19, %v1470_v3 }
 0x1f1   :  { %v748_v17 = vpop.f32.mrf.mxu1 }
 0x1f2   :  { %793 = vst.msk [vmem:[%s1637_s5 + $0xf0] sm:$0xff] %vm77_vm1, %v757_v21  ;;  %v749_v14 = vadd.f32 %v1470_v3, %v748_v17 }
 0x1f3   :  { %v979_v22 = vpop.f32.mrf.mxu1 }
 0x1f4   :  { %791 = vst.msk [vmem:[%s1637_s5 + $0xe0] sm:$0xff] %vm77_vm1, %v749_v14  ;;  %v760_v28 = vadd.f32 %v979_v22, %v1470_v3 }
 0x1f5   :  { %v751_v34 = vpop.f32.mrf.mxu1 }
 0x1f6   :  { %794 = vst.msk [vmem:[%s1637_s5 + $0xf8] sm:$0xff] %vm77_vm1, %v760_v28  ;;  %v752_v58 = vadd.f32 %v1470_v3, %v751_v34 }
 0x1f8   :  { %792 = vst.msk [vmem:[%s1637_s5 + $0xe8] sm:$0xff] %vm77_vm1, %v752_v58 }

</bundles_post_ra>
